<compile_context>
chip_gen: v7x
topology: tpu7x:2x2x1
jax: 0.10.0
libtpu: 0.0.40
codegen_flags: <defaults>
</compile_context>

<pallas_src>
import functools

import jax
import jax.numpy as jnp
from jax.experimental import pallas as pl
from jax.experimental.pallas import tpu as pltpu

LANE = 128
TILE_R_MAX = 1024  # rows per grid step; 1024*128*4B = 512 KiB per f32 input block


def _round_up(x, m):
    return ((x + m - 1) // m) * m


def _focal_terms(x, z, gamma, alpha, in_kernel):
    """Elementwise focal-BCE loss (f32 in, f32 out). EUP-lean formulation."""
    e = jnp.exp(-jnp.abs(x))                          # exp(-|x|) in (0, 1]
    # Stable BCEWithLogits: max(x,0) - x*z + log(1 + exp(-|x|))
    bce = jnp.maximum(x, 0.0) - x * z + jnp.log1p(e)
    # sigmoid pieces, reusing e (no second exp):
    if in_kernel:
        inv = pl.reciprocal(1.0 + e, approx=True)     # 1 / (1 + e)
    else:
        inv = 1.0 / (1.0 + e)
    s_hi = inv                                        # sigmoid(|x|)
    s_lo = e * inv                                    # 1 - sigmoid(|x|)
    pos = x >= 0.0
    p = jnp.where(pos, s_hi, s_lo)                    # sigmoid(x)
    q = jnp.where(pos, s_lo, s_hi)                    # 1 - sigmoid(x)
    # 1 - p_t = z*(1-p) + (1-z)*p   (non-negative by construction -> sqrt-safe)
    t = z * q + (1.0 - z) * p
    af = z * alpha + (1.0 - z) * (1.0 - alpha)
    if gamma == 1.5:
        mf = t * jnp.sqrt(t)
    elif gamma == 2.0:
        mf = t * t
    elif gamma == 1.0:
        mf = t
    else:
        mf = t ** gamma
    return bce * af * mf


def _focal_loss_kernel(pred_ref, true_ref, out_ref, *, gamma, alpha,
                       tile_r, valid_rows, needs_mask):
    i = pl.program_id(0)

    x = pred_ref[...].astype(jnp.float32)
    z = true_ref[...].astype(jnp.float32)
    loss = _focal_terms(x, z, gamma, alpha, in_kernel=True)   # (tile_r, LANE)

    def _fold(v):
        # Fold tile rows into 8 sublanes: pure VALU adds, no cross-lane reduce.
        return v.reshape(tile_r // 8, 8, LANE).sum(axis=0)

    if needs_mask:
        last = pl.num_programs(0) - 1

        @pl.when(i == last)
        def _():
            row = jax.lax.broadcasted_iota(jnp.int32, (tile_r, LANE), 0)
            valid = (i * tile_r + row) < valid_rows
            out_ref[...] = _fold(jnp.where(valid, loss, 0.0))

        @pl.when(i != last)
        def _():
            out_ref[...] = _fold(loss)
    else:
        out_ref[...] = _fold(loss)


def focal_loss(pred, true, gamma=1.5, alpha=0.25, reduction='mean'):
    """Focal loss (BCE-with-logits base) with 'mean' or 'sum' reduction."""
    assert pred.shape == true.shape
    n = pred.size

    flat_pred = pred.reshape(-1)          # native dtype, no upcast copy
    flat_true = true.reshape(-1)

    n_main = (n // LANE) * LANE
    rem = n - n_main                       # < 128 leftover, done in plain JAX

    total = jnp.float32(0.0)

    if n_main:
        rows = n_main // LANE
        pred2 = flat_pred[:n_main].reshape(rows, LANE)
        true2 = flat_true[:n_main].reshape(rows, LANE)

        tile_r = min(TILE_R_MAX, _round_up(rows, 16))   # mult of 16: bf16-safe
        num_blocks = (rows + tile_r - 1) // tile_r
        needs_mask = (rows % tile_r) != 0

        kernel = functools.partial(
            _focal_loss_kernel,
            gamma=float(gamma), alpha=float(alpha),
            tile_r=int(tile_r), valid_rows=int(rows),
            needs_mask=bool(needs_mask))

        partials = pl.pallas_call(
            kernel,
            out_shape=jax.ShapeDtypeStruct((num_blocks * 8, LANE), jnp.float32),
            grid_spec=pltpu.PrefetchScalarGridSpec(
                num_scalar_prefetch=0,
                grid=(num_blocks,),
                in_specs=[
                    pl.BlockSpec((tile_r, LANE), lambda i: (i, 0)),
                    pl.BlockSpec((tile_r, LANE), lambda i: (i, 0)),
                ],
                out_specs=pl.BlockSpec((8, LANE), lambda i: (i, 0)),
            ),
            compiler_params=pltpu.CompilerParams(
                dimension_semantics=("parallel",)),
        )(pred2, true2)

        total = total + jnp.sum(partials)

    if rem:
        tail_x = flat_pred[n_main:].astype(jnp.float32)
        tail_z = flat_true[n_main:].astype(jnp.float32)
        total = total + jnp.sum(
            _focal_terms(tail_x, tail_z, gamma, alpha, in_kernel=False))

    if reduction == 'mean':
        return total / jnp.float32(n)
    elif reduction == 'sum':
        return total
    else:
        # TODO(synk): reduction='none' (elementwise output) not implemented as a Pallas kernel.
        raise NotImplementedError("reduction='none' not supported")


def _focal_loss_ref(pred, true, gamma=1.5, alpha=0.25):
    """Pure-JAX reference mirroring the PyTorch module (reduction='mean')."""
    x = pred.astype(jnp.float32)
    z = true.astype(jnp.float32)
    bce = jnp.maximum(x, 0.0) - x * z + jnp.log1p(jnp.exp(-jnp.abs(x)))
    p = jax.nn.sigmoid(x)
    p_t = z * p + (1 - z) * (1 - p)
    af = z * alpha + (1 - z) * (1 - alpha)
    mf = (1.0 - p_t) ** gamma
    return jnp.mean(bce * af * mf)


if __name__ == "__main__":
    key = jax.random.PRNGKey(0)
    k1, k2 = jax.random.split(key)

    # YOLO-style per-anchor objectness/class logits: NCHW (2, 4, 16, 16)
    pred = jax.random.normal(k1, (2, 4, 16, 16), dtype=jnp.float32) * 2.0
    true = (jax.random.uniform(k2, (2, 4, 16, 16)) > 0.7).astype(jnp.float32)

    out = focal_loss(pred, true, gamma=1.5, alpha=0.25, reduction='mean')
    out = jax.block_until_ready(out)

    ref = _focal_loss_ref(pred, true)
    assert jnp.allclose(out, ref, rtol=1e-3, atol=1e-6), (out, ref)

    print("KERNEL_OK")
</pallas_src>

<mosaic_0001>
module attributes {stable_mosaic.version = 11 : i64} {
  func.func @_focal_loss_kernel(%arg0: i32, %arg1: memref<16x128xf32, #tpu.memory_space<vmem>>, %arg2: memref<16x128xf32, #tpu.memory_space<vmem>>, %arg3: memref<8x128xf32, #tpu.memory_space<vmem>>) attributes {dimension_semantics = [#tpu.dimension_semantics<parallel>], iteration_bounds = array<i64: 1>, scalar_prefetch = 0 : i64, scratch_operands = 0 : i64, tpu.core_type = #tpu.core_type<tc>, window_params = [{transform_indices = @transform_0, window_bounds = array<i64: 16, 128>}, {transform_indices = @transform_1, window_bounds = array<i64: 16, 128>}, {transform_indices = @transform_2, window_bounds = array<i64: 8, 128>}]} {
    %c0 = arith.constant 0 : index
    %c0_0 = arith.constant 0 : index
    %0 = vector.load %arg1[%c0, %c0_0] : memref<16x128xf32, #tpu.memory_space<vmem>>, vector<16x128xf32>
    %c0_1 = arith.constant 0 : index
    %c0_2 = arith.constant 0 : index
    %1 = vector.load %arg2[%c0_1, %c0_2] : memref<16x128xf32, #tpu.memory_space<vmem>>, vector<16x128xf32>
    %2 = math.absf %0 : vector<16x128xf32>
    %cst = arith.constant 0.000000e+00 : f32
    %3 = vector.broadcast %cst : f32 to vector<16x128xf32>
    %4 = arith.subf %3, %2 : vector<16x128xf32>
    %5 = math.exp %4 : vector<16x128xf32>
    %cst_3 = arith.constant 0.000000e+00 : f32
    %6 = vector.broadcast %cst_3 : f32 to vector<16x128xf32>
    %7 = arith.maximumf %0, %6 : vector<16x128xf32>
    %8 = arith.mulf %0, %1 : vector<16x128xf32>
    %9 = arith.subf %7, %8 : vector<16x128xf32>
    %10 = math.log1p %5 : vector<16x128xf32>
    %11 = arith.addf %9, %10 : vector<16x128xf32>
    %cst_4 = arith.constant 1.000000e+00 : f32
    %12 = vector.broadcast %cst_4 : f32 to vector<16x128xf32>
    %13 = arith.addf %12, %5 : vector<16x128xf32>
    %14 = tpu.reciprocal %13 {approx = true} : vector<16x128xf32> -> vector<16x128xf32>
    %15 = arith.mulf %5, %14 : vector<16x128xf32>
    %cst_5 = arith.constant 0.000000e+00 : f32
    %16 = vector.broadcast %cst_5 : f32 to vector<16x128xf32>
    %17 = arith.cmpf oge, %0, %16 : vector<16x128xf32>
    %18 = arith.select %17, %14, %15 : vector<16x128xi1>, vector<16x128xf32>
    %19 = arith.select %17, %15, %14 : vector<16x128xi1>, vector<16x128xf32>
    %20 = arith.mulf %1, %19 : vector<16x128xf32>
    %cst_6 = arith.constant 1.000000e+00 : f32
    %21 = vector.broadcast %cst_6 : f32 to vector<16x128xf32>
    %22 = arith.subf %21, %1 : vector<16x128xf32>
    %23 = arith.mulf %22, %18 : vector<16x128xf32>
    %24 = arith.addf %20, %23 : vector<16x128xf32>
    %cst_7 = arith.constant 2.500000e-01 : f32
    %25 = vector.broadcast %cst_7 : f32 to vector<16x128xf32>
    %26 = arith.mulf %1, %25 : vector<16x128xf32>
    %cst_8 = arith.constant 1.000000e+00 : f32
    %27 = vector.broadcast %cst_8 : f32 to vector<16x128xf32>
    %28 = arith.subf %27, %1 : vector<16x128xf32>
    %cst_9 = arith.constant 7.500000e-01 : f32
    %29 = vector.broadcast %cst_9 : f32 to vector<16x128xf32>
    %30 = arith.mulf %28, %29 : vector<16x128xf32>
    %31 = arith.addf %26, %30 : vector<16x128xf32>
    %32 = math.sqrt %24 : vector<16x128xf32>
    %33 = arith.mulf %24, %32 : vector<16x128xf32>
    %34 = arith.mulf %11, %31 : vector<16x128xf32>
    %35 = arith.mulf %34, %33 : vector<16x128xf32>
    %36 = vector.shape_cast %35 : vector<16x128xf32> to vector<2x8x128xf32>
    %cst_10 = arith.constant dense<0.000000e+00> : vector<8x128xf32>
    %37 = vector.multi_reduction <add>, %36, %cst_10 [0] : vector<2x8x128xf32> to vector<8x128xf32>
    %c0_11 = arith.constant 0 : index
    %c0_12 = arith.constant 0 : index
    %38 = vector.load %arg3[%c0_11, %c0_12] : memref<8x128xf32, #tpu.memory_space<vmem>>, vector<8x128xf32>
    tpu.vector_store %arg3[%c0_11, %c0_12], %37 {strides = array<i32>} : memref<8x128xf32, #tpu.memory_space<vmem>>, vector<8x128xf32>,
    return
  }
  func.func @transform_0(%arg0: i32) -> (i32, i32) {
    %c0_i32 = arith.constant 0 : i32
    %c0_i32_0 = arith.constant 0 : i32
    return %arg0, %c0_i32 : i32, i32
  }
  func.func @transform_1(%arg0: i32) -> (i32, i32) {
    %c0_i32 = arith.constant 0 : i32
    %c0_i32_0 = arith.constant 0 : i32
    return %arg0, %c0_i32 : i32, i32
  }
  func.func @transform_2(%arg0: i32) -> (i32, i32) {
    %c0_i32 = arith.constant 0 : i32
    %c0_i32_0 = arith.constant 0 : i32
    return %arg0, %c0_i32 : i32, i32
  }
}

</mosaic_0001>

<bundles_post_ra>
// kernel: tpu_custom_call.1
= control target key start
LH: loop header
LB: loop body
LE: loop exit
PB: predicated region body
PF: predicated region fallthrough
CT: control target
= control target key end

     0   :  { %7 = vsyncpa [#allocation3], 0  ;;  %s291_s0 = inlined_call_operand.hbm [shape: f32[16,128], index: 0, kind: input, shape index: {}]   ;;  %s292_s1 = inlined_call_operand.hbm [shape: f32[16,128], index: 1, kind: input, shape index: {}]   ;;  %s293_s2 = inlined_call_operand.hbm [shape: f32[8,128], index: 2, kind: output, shape index: {}]  }
   0x1   :  { %8 = vsyncpa [#allocation6], 0 }
   0x2   :  { %9 = vsyncpa [#allocation4], 0  ;;  %s235_s9 = smov [#allocation2]   ;;  %s163_s13 = scalar_lea.hbm %s291_s0, 256 }
   0x3   :  { %s15_s10 = sshll.u32 %s235_s9, 4  ;;  %p164_p0 = scmp.ne.s32.totalorder %s291_s0, %s163_s13  ;;  %s16_s10 = int_to_ptr.vmem [resolvable:$true] %s15_s10 }
   0x4   :  { %p167_p1 = scmp.lt.u32.totalorder %s163_s13, %s291_s0 }
   0x6   :  { %p169_p2 = pnand %p167_p1, %p164_p0 }
   0x8   :  { %172 = shalt.err (!%p169_p2)
}
   0x9   :  { %s173_s18 = scalar_lea.vmem %s16_s10, 256  ;;  %p178_p4 = scmp.lt.s32.totalorder %s16_s10, %s16_s10 }
   0xa   :  { %p174_p3 = scmp.ne.s32.totalorder %s16_s10, %s173_s18  ;;  %p179_p5 = scmp.lt.s32.totalorder %s173_s18, %s173_s18 }
   0xc   :  { %p180_p6 = por %p179_p5, %p178_p4 }
   0xe   :  { %p181_p7 = pnand %p180_p6, %p174_p3 }
  0x10   :  { %184 = shalt.err (!%p181_p7)
}
  0x11   :  { %s236_s19 = smov 128   ;;  %s237_s20 = smov 8  }
  0x12   :  { %21 = dma.hbm_to_vmem [thread:$0]  %s291_s0, 256, %s16_s10, [#allocation3], %s236_s19, %s236_s19, %s237_s20  }
  0x13   :  { %s238_s23 = smov [#allocation5]   ;;  %s185_s27 = scalar_lea.hbm %s292_s1, 256 }
  0x14   :  { %s27_s24 = sshll.u32 %s238_s23, 4  ;;  %p186_p8 = scmp.ne.s32.totalorder %s292_s1, %s185_s27  ;;  %s28_s24 = int_to_ptr.vmem [resolvable:$true] %s27_s24 }
  0x15   :  { %p189_p9 = scmp.lt.u32.totalorder %s185_s27, %s292_s1 }
  0x17   :  { %p191_p10 = pnand %p189_p9, %p186_p8 }
  0x19   :  { %194 = shalt.err (!%p191_p10)
}
  0x1a   :  { %s195_s4 = scalar_lea.vmem %s28_s24, 256  ;;  %p200_p12 = scmp.lt.s32.totalorder %s28_s24, %s28_s24 }
  0x1b   :  { %p196_p11 = scmp.ne.s32.totalorder %s28_s24, %s195_s4  ;;  %p201_p13 = scmp.lt.s32.totalorder %s195_s4, %s195_s4 }
  0x1d   :  { %p202_p0 = por %p201_p13, %p200_p12 }
  0x1f   :  { %p203_p1 = pnand %p202_p0, %p196_p11 }
  0x21   :  { %206 = shalt.err (!%p203_p1)
}
  0x22   :  { %33 = dma.hbm_to_vmem [thread:$0]  %s292_s1, 256, %s28_s24, [#allocation6], %s236_s19, %s236_s19, %s237_s20  }
  0x23   :  { %229 = dma.done.wait [#allocation3], 256  }
  0x24   :  { %230 = vsyncadd [#allocation3], 4294967040 }
  0x25   :  { %231 = dma.done.wait [#allocation6], 256  }
  0x26   :  { %232 = vsyncadd [#allocation6], 4294967040  ;;  %v40_v0 = vld [vmem:[#allocation2] sm:$0xff]  ;;  %v41_v1 = vld [vmem:[#allocation2 + $0x8] sm:$0xff]  ;;  %s239_s1 = smov [#allocation7]  }
  0x27   :  { %v44_v2 = vand.u32 2147483647, %v40_v0  ;;  %v45_v3 = vand.u32 2147483647, %v41_v1  ;;  %v42_v12 = vld [vmem:[#allocation5] sm:$0xff]  ;;  %v43_v13 = vld [vmem:[#allocation5 + $0x8] sm:$0xff] }
  0x28   :  { %vm84_vm0 = vcmp.ge.f32.partialorder %v40_v0, 0.0  ;;  %v92_v15 = vsub.f32 1.0, %v42_v12  ;;  %vm85_vm1 = vcmp.ge.f32.partialorder %v41_v1, 0.0  ;;  %v93_v18 = vsub.f32 1.0, %v43_v13  ;;  %s132_s6 = sshll.u32 %s239_s1, 4  ;;  %s133_s6 = int_to_ptr.vmem [resolvable:$true] %s132_s6 }
  0x29   :  { %v46_v4 = vsub.f32 0.0, %v44_v2  ;;  %v47_v5 = vsub.f32 0.0, %v45_v3  ;;  %v52_v38 = vmax.f32 %v40_v0, 0.0  ;;  %v54_v39 = vmul.f32 %v42_v12, %v40_v0  ;;  %s207_s7 = scalar_lea.vmem %s133_s6, 128  ;;  %p212_p3 = scmp.lt.s32.totalorder %s133_s6, %s133_s6 }
  0x2a   :  { %v53_v40 = vmax.f32 %v41_v1, 0.0  ;;  %v55_v41 = vmul.f32 %v43_v13, %v41_v1  ;;  %v98_v47 = vmul.f32 0.25, %v42_v12  ;;  %v100_v48 = vmul.f32 0.75, %v92_v15  ;;  %p208_p2 = scmp.ne.s32.totalorder %s133_s6, %s207_s7  ;;  %p213_p4 = scmp.lt.s32.totalorder %s207_s7, %s207_s7 }
  0x2b   :  { %v48_v6 = vmul.f32 1.442695, %v46_v4  ;;  %v50_v7 = vmul.f32 1.442695, %v47_v5  ;;  %v56_v46 = vsub.f32 %v52_v38, %v54_v39  ;;  %v99_v51 = vmul.f32 0.25, %v43_v13 }
  0x2c   :  { %v57_v49 = vsub.f32 %v53_v40, %v55_v41  ;;  %v101_v52 = vmul.f32 0.75, %v93_v18  ;;  %v102_v55 = vadd.f32 %v100_v48, %v98_v47  ;;  %p214_p5 = por %p213_p4, %p212_p3 }
  0x2d   :  { %147 = vpow2.f32 %v48_v6 }
  0x2e   :  { %149 = vpow2.f32 %v50_v7  ;;  %v103_v58 = vadd.f32 %v101_v52, %v99_v51  ;;  %p215_p6 = pnand %p214_p5, %p208_p2 }
  0x37   :  { %v148_v8 = vpop.eup %147 }
  0x38   :  { %v150_v9 = vpop.eup %149  ;;  %v58_v10 = vadd.f32 1.0, %v148_v8  ;;  %v61_v19 = vmul.f32 -0.5, %v148_v8  ;;  %v64_v33 = vand.u32 2147483647, %v148_v8 }
  0x39   :  { %v67_v11 = vadd.f32 1.0, %v150_v9  ;;  %v70_v21 = vmul.f32 -0.5, %v150_v9  ;;  %v73_v37 = vand.u32 2147483647, %v150_v9 }
  0x3a   :  { %151 = vrcp.f32 %v58_v10  ;;  %v62_v30 = vadd.f32 1.0, %v61_v19  ;;  %vm65_vm2 = vcmp.lt.f32.partialorder %v64_v33, 0.0004427343 }
  0x3b   :  { %153 = vrcp.f32 %v67_v11  ;;  %v71_v34 = vadd.f32 1.0, %v70_v21  ;;  %vm74_vm3 = vcmp.lt.f32.partialorder %v73_v37, 0.0004427343 }
  0x3c   :  { %155 = vlog2.f32 %v58_v10  ;;  %v63_v43 = vmul.f32 %v148_v8, %v62_v30 }
  0x3d   :  { %157 = vlog2.f32 %v67_v11  ;;  %v72_v45 = vmul.f32 %v150_v9, %v71_v34 }
  0x44   :  { %v152_v14 = vpop.eup %151 }
  0x45   :  { %v154_v16 = vpop.eup %153  ;;  %v82_v17 = vmul.f32 %v152_v14, %v148_v8 }
  0x46   :  { %v83_v20 = vmul.f32 %v154_v16, %v150_v9  ;;  %v156_v32 = vpop.eup %155 }
  0x47   :  { %v86_v22 = vsel %vm84_vm0, %v152_v14, %v82_v17  ;;  %v88_v23 = vsel %vm84_vm0, %v82_v17, %v152_v14  ;;  %v158_v36 = vpop.eup %157  ;;  %v60_v42 = vmul.f32 0.6931472, %v156_v32 }
  0x48   :  { %v87_v24 = vsel %vm85_vm1, %v154_v16, %v83_v20  ;;  %v89_v25 = vsel %vm85_vm1, %v83_v20, %v154_v16  ;;  %v90_v26 = vmul.f32 %v88_v23, %v42_v12  ;;  %v94_v27 = vmul.f32 %v92_v15, %v86_v22 }
  0x49   :  { %v91_v28 = vmul.f32 %v89_v25, %v43_v13  ;;  %v95_v29 = vmul.f32 %v93_v18, %v87_v24  ;;  %v69_v44 = vmul.f32 0.6931472, %v158_v36  ;;  %v66_v50 = vsel %vm65_vm2, %v63_v43, %v60_v42 }
  0x4a   :  { %v96_v31 = vadd.f32 %v94_v27, %v90_v26  ;;  %v76_v54 = vadd.f32 %v66_v50, %v56_v46 }
  0x4b   :  { %v97_v35 = vadd.f32 %v95_v29, %v91_v28  ;;  %v75_v53 = vsel %vm74_vm3, %v72_v45, %v69_v44 }
  0x4c   :  { %159 = vrsqrt.f32 %v96_v31  ;;  %v77_v57 = vadd.f32 %v75_v53, %v57_v49  ;;  %vm106_vm4 = vcmp.eq.f32.partialorder %v96_v31, inf  ;;  %v109_v59 = vand.u32 2147483648, %v96_v31 }
  0x4d   :  { %161 = vrsqrt.f32 %v97_v35  ;;  %vm108_vm5 = vcmp.eq.f32.partialorder %v96_v31, 0.0  ;;  %vm113_vm6 = vcmp.eq.f32.partialorder %v97_v35, inf  ;;  %v116_v62 = vand.u32 2147483648, %v97_v35 }
  0x4e   :  { %vm115_vm7 = vcmp.eq.f32.partialorder %v97_v35, 0.0  ;;  %v120_v1 = vmul.f32 %v102_v55, %v76_v54  ;;  %v121_v4 = vmul.f32 %v103_v58, %v77_v57 }
  0x56   :  { %v160_v56 = vpop.eup %159 }
  0x57   :  { %v162_v60 = vpop.eup %161  ;;  %v105_v61 = vmul.f32 %v160_v56, %v96_v31 }
  0x58   :  { %v112_v63 = vmul.f32 %v162_v60, %v97_v35 }
  0x59   :  { %v107_v0 = vsel %vm106_vm4, %v96_v31, %v105_v61 }
  0x5a   :  { %v110_v2 = vsel %vm108_vm5, %v109_v59, %v107_v0  ;;  %v114_v3 = vsel %vm113_vm6, %v97_v35, %v112_v63 }
  0x5b   :  { %v117_v5 = vsel %vm115_vm7, %v116_v62, %v114_v3  ;;  %v118_v6 = vmul.f32 %v110_v2, %v96_v31 }
  0x5c   :  { %v119_v7 = vmul.f32 %v117_v5, %v97_v35 }
  0x5d   :  { %v122_v8 = vmul.f32 %v120_v1, %v118_v6 }
  0x5e   :  { %v123_v9 = vmul.f32 %v121_v4, %v119_v7 }
  0x60   :  { %v124_v10 = vadd.f32 %v123_v9, %v122_v8 }
  0x62   :  { %125 = vst [vmem:[#allocation7] sm:$0xff] %v124_v10 }
  0x63   :  { %218 = shalt.err (!%p215_p6)
}
  0x64   :  { %s219_s10 = scalar_lea.hbm %s293_s2, 128 }
  0x65   :  { %p220_p7 = scmp.ne.s32.totalorder %s293_s2, %s219_s10  ;;  %p223_p8 = scmp.lt.u32.totalorder %s219_s10, %s293_s2 }
  0x67   :  { %p225_p9 = pnand %p223_p8, %p220_p7 }
  0x69   :  { %228 = shalt.err (!%p225_p9)
}
  0x6a   :  { %135 = dma.vmem_to_hbm [thread:$0]  %s133_s6, 128, %s293_s2, [#allocation4]  }
  0x6b   :  { %233 = dma.done.wait [#allocation4], 128  }
  0x6c   :  { %234 = vsyncadd [#allocation4], 4294967168 }
  0x6d   :  { %139 = vsyncpa [#allocation3], 1 }
  0x6e   :  { %140 = vsyncpa [#allocation6], 1 }
  0x6f   :  { %141 = vsyncpa [#allocation4], 1 }

</bundles_post_ra>
